<compile_context>
chip_gen: v7x
topology: tpu7x:2x2x1
jax: 0.10.0
libtpu: 0.0.40
codegen_flags: <defaults>
</compile_context>

<pallas_src>
import functools
import re

import jax
import jax.numpy as jnp
import numpy as np
from jax import lax
from jax.experimental import pallas as pl
from jax.experimental.pallas import tpu as pltpu

EPS_PPO = 1e-05
_LANES = 128
_SUBLANES = 8


def _tpu_generation():
    """Best-effort TPU generation (4, 5, 6, 7, ...); 0 if unknown."""
    try:
        kind = jax.devices()[0].device_kind
    except Exception:
        return 0
    m = re.search(r"(\d+)", kind)
    return int(m.group(1)) if m else 0


def _sum_all(x):
    # Full reduce -> (1, 1): lane (XLU) reduce first, then sublane reduce.
    return jnp.sum(jnp.sum(x, axis=-1, keepdims=True), axis=0, keepdims=True)


# ----------------------------------------------------------------------------
# Layout helper: pack PyTorch-style (B,1)/(B,) rollout tensors ONCE into the
# lane-dense (R, 128) layout the loss kernel consumes (zero padded).
# ----------------------------------------------------------------------------
def pack_rollout(x):
    x = jnp.asarray(x).reshape(-1)
    b = x.shape[0]
    r = pl.cdiv(b, _LANES)
    pad = r * _LANES - b
    if pad:
        x = jnp.pad(x, (0, pad))
    return x.reshape(r, _LANES)


def _is_packed(x):
    return x.ndim == 2 and x.shape[-1] == _LANES


# ----------------------------------------------------------------------------
# Kernel 1: fused PPO loss (advantage normalization + policy + value loss)
# ----------------------------------------------------------------------------
def _ppo_loss_kernel(ent_ref, ret_ref, vpred_ref, val_ref, alp_ref, oalp_ref,
                     losses_ref, *adv_out,
                     n, clip_param, value_loss_coef, entropy_coef,
                     use_clipped_value_loss):
    ret = ret_ref[...].astype(jnp.float32)      # (R, 128) rollouts.returns[:-1]
    vpred = vpred_ref[...].astype(jnp.float32)  # (R, 128) value_preds[:-1]
    val = val_ref[...].astype(jnp.float32)      # (R, 128) fresh critic values
    alp = alp_ref[...].astype(jnp.float32)      # (R, 128) new action log-probs
    oalp = oalp_ref[...].astype(jnp.float32)    # (R, 128) old action log-probs
    ent = ent_ref[0]                            # SMEM scalar dist_entropy

    shape = ret.shape
    padded = (shape[0] * shape[1]) != n         # static (trace-time) decision
    inv_n = 1.0 / n
    inv_nm1 = 1.0 / (n - 1.0)                   # torch.std unbiased; wrapper guards n>=2

    # advantages = (adv - mean) / (std + EPS_PPO)
    # Padded lanes of every operand are exactly zero, so adv and adv*adv are
    # zero there -> the single-pass sums need no mask.
    adv = ret - vpred
    mean = _sum_all(adv) * inv_n                                 # (1, 1)
    ss = _sum_all(adv * adv)                                     # (1, 1)
    var = (ss - n * mean * mean) * inv_nm1
    # exact reciprocal: approx EUP rcp error can exceed the 1e-4 adv tolerance
    inv_std = pl.reciprocal(jnp.sqrt(var) + EPS_PPO, approx=False)
    adv_n = (adv - mean) * inv_std
    if padded:
        # single mask select: zeroes padded lanes of adv_n (fixes the surrogate
        # sum AND makes the packed advantage output clean).
        row = lax.broadcasted_iota(jnp.int32, shape, 0)
        col = lax.broadcasted_iota(jnp.int32, shape, 1)
        adv_n = jnp.where((row * shape[1] + col) < n, adv_n, 0.0)

    # clipped surrogate policy loss (padded lanes: ratio=1, adv_n=0 -> term 0)
    ratio = jnp.exp(alp - oalp)
    surr1 = ratio * adv_n
    surr2 = jnp.clip(ratio, 1.0 - clip_param, 1.0 + clip_param) * adv_n
    action_loss = -_sum_all(jnp.minimum(surr1, surr2)) * inv_n   # (1, 1)

    # clipped value loss (padded lanes are exactly zero -> no mask needed)
    if use_clipped_value_loss:
        vpred_clipped = vpred + jnp.clip(val - vpred, -clip_param, clip_param)
        vl = (val - ret) ** 2
        vlc = (vpred_clipped - ret) ** 2
        value_loss = 0.5 * _sum_all(jnp.maximum(vl, vlc)) * inv_n
    else:
        value_loss = 0.5 * _sum_all((ret - val) ** 2) * inv_n

    total = value_loss * value_loss_coef + action_loss - ent * entropy_coef

    # single lane-dense output row: lane0=value_loss, lane1=action_loss, lane2=total
    lane = lax.broadcasted_iota(jnp.int32, (1, _LANES), 1)
    losses_ref[...] = (jnp.where(lane == 0, value_loss, 0.0)
                       + jnp.where(lane == 1, action_loss, 0.0)
                       + jnp.where(lane == 2, total, 0.0))
    if adv_out:
        adv_out[0][...] = adv_n


def ppo_losses(returns, value_preds, values, action_log_probs,
               old_action_log_probs, dist_entropy, *, n=None,
               clip_param=0.2, value_loss_coef=0.5, entropy_coef=0.01,
               use_clipped_value_loss=True, return_advantages=False):
    """PPO minibatch losses.

    Operands may be PyTorch-style (B,1)/(B,) tensors OR pre-packed (R,128)
    tensors produced once per rollout by `pack_rollout` (zero padded). For
    fully/partially packed inputs pass `n=B` explicitly. f32 or bf16 accepted.
    Returns (value_loss, action_loss, total_loss[, advantages_packed]).
    """
    ops = [jnp.asarray(x) for x in (returns, value_preds, values,
                                    action_log_probs, old_action_log_probs)]
    if n is None:
        for x in ops:
            if not _is_packed(x):
                n = int(np.prod(x.shape))
                break
        else:
            n = int(ops[0].shape[0]) * _LANES
    n = int(n)
    if n < 2:
        raise ValueError("ppo_losses requires n >= 2 (torch.std is unbiased; "
                         "n == 1 would be NaN).")
    R = int(pl.cdiv(n, _LANES))
    packed = [x if _is_packed(x) else pack_rollout(x) for x in ops]
    for x in packed:
        assert x.shape == (R, _LANES), (x.shape, (R, _LANES))
    ent = jnp.asarray(dist_entropy, jnp.float32).reshape(1)

    kernel = functools.partial(
        _ppo_loss_kernel,
        n=n,
        clip_param=float(clip_param),
        value_loss_coef=float(value_loss_coef),
        entropy_coef=float(entropy_coef),
        use_clipped_value_loss=bool(use_clipped_value_loss),
    )

    vmem = pl.BlockSpec(memory_space=pltpu.MemorySpace.VMEM)
    smem = pl.BlockSpec(memory_space=pltpu.MemorySpace.SMEM)

    out_shape = [jax.ShapeDtypeStruct((1, _LANES), jnp.float32)]  # [vloss, aloss, total]
    out_specs = [vmem]
    if return_advantages:
        out_shape.append(jax.ShapeDtypeStruct((R, _LANES), jnp.float32))
        out_specs.append(vmem)

    # TODO(synk): for very large minibatches (B >~ 100K) add a grid over R with
    # a two-pass scratch-accumulator reduction instead of growing the VMEM limit.
    op_bytes = (5 + len(out_shape)) * R * _LANES * 4
    compiler_params = None
    if op_bytes > (6 << 20):
        compiler_params = pltpu.CompilerParams(
            vmem_limit_bytes=int(min(4 * op_bytes, 120 << 20)))

    outs = pl.pallas_call(
        kernel,
        out_shape=tuple(out_shape),
        in_specs=[smem] + [vmem] * 5,
        out_specs=tuple(out_specs),
        compiler_params=compiler_params,
    )(ent, *packed)

    losses = outs[0]
    value_loss, action_loss, total = losses[0, 0], losses[0, 1], losses[0, 2]
    if return_advantages:
        return value_loss, action_loss, total, outs[1]
    return value_loss, action_loss, total


# ----------------------------------------------------------------------------
# Kernel 2: intrinsic reward = eta * MSE(real_feat, pred_feat).mean(-1, keepdim)
# ----------------------------------------------------------------------------
def _intrinsic_reward_kernel(real_ref, pred_ref, out_ref, *, eta_over_f):
    diff = real_ref[...].astype(jnp.float32) - pred_ref[...].astype(jnp.float32)
    out_ref[...] = eta_over_f * jnp.sum(diff * diff, axis=-1, keepdims=True)
    # TODO(synk): for very large B a lane-dense packed (R,128) output (feeding
    # the packed loss layout) would replace the narrow (TB,1) masked stores.


def compute_intrinsic_reward(real_next_state_feature, pred_next_state_feature,
                             *, eta=0.01, vmem_budget_bytes=None, tb_cap=None):
    real = jnp.asarray(real_next_state_feature)
    pred = jnp.asarray(pred_next_state_feature)
    B, F = (int(d) for d in real.shape)
    itemsize = max(jnp.dtype(real.dtype).itemsize, jnp.dtype(pred.dtype).itemsize)
    sub = _SUBLANES * max(1, 4 // itemsize)   # (8,128) tile f32, (16,128) bf16

    gen = _tpu_generation()
    if gen >= 7:
        # v7x: 64 MiB physical VMEM (32 MiB scoped) shared by 2 TCs -> small tiles.
        budget = (8 << 20) if vmem_budget_bytes is None else vmem_budget_bytes
        cap = 1024 if tb_cap is None else tb_cap
    else:
        # v5e / v6e: 128 MiB VMEM -> bigger tiles, fewer ~0.35us grid steps.
        budget = (24 << 20) if vmem_budget_bytes is None else vmem_budget_bytes
        cap = 4096 if tb_cap is None else tb_cap

    # 2 inputs x 2 pipeline buffers x TB x F x itemsize <= budget
    tb_fit = max(sub, (budget // (2 * 2 * F * itemsize)) // sub * sub)
    TB = int(min(cap, tb_fit, pl.cdiv(B, sub) * sub))
    grid_len = int(pl.cdiv(B, TB))   # no padding: boundary block is masked by Pallas

    # v7x: split batch tiles across both TensorCores; on single-TC generations
    # "parallel" vs "arbitrary" makes no measurable difference.
    if gen >= 7 and grid_len >= 2:
        sem = (pltpu.CORE_PARALLEL,)
    else:
        sem = ("parallel",)

    out = pl.pallas_call(
        functools.partial(_intrinsic_reward_kernel, eta_over_f=float(eta) / F),
        grid=(grid_len,),
        out_shape=jax.ShapeDtypeStruct((B, 1), jnp.float32),
        in_specs=[pl.BlockSpec((TB, F), lambda i: (i, 0)),
                  pl.BlockSpec((TB, F), lambda i: (i, 0))],
        out_specs=pl.BlockSpec((TB, 1), lambda i: (i, 0)),
        compiler_params=pltpu.CompilerParams(
            dimension_semantics=sem,
            vmem_limit_bytes=int(min(budget + (8 << 20), 112 << 20))),
    )(real, pred)
    return out


# ----------------------------------------------------------------------------
# Pure-JAX reference (mirrors the PyTorch math) for correctness checks.
# ----------------------------------------------------------------------------
def _ref_losses(ret, vpred, val, alp, oalp, ent, clip, vcoef, ecoef):
    adv = ret - vpred
    adv_n = (adv - adv.mean()) / (adv.std(ddof=1) + EPS_PPO)
    ratio = jnp.exp(alp - oalp)
    s1 = ratio * adv_n
    s2 = jnp.clip(ratio, 1 - clip, 1 + clip) * adv_n
    aloss = -jnp.minimum(s1, s2).mean()
    vpc = vpred + jnp.clip(val - vpred, -clip, clip)
    vloss = 0.5 * jnp.maximum((val - ret) ** 2, (vpc - ret) ** 2).mean()
    total = vloss * vcoef + aloss - ent * ecoef
    return vloss, aloss, total, adv_n


if __name__ == "__main__":
    key = jax.random.PRNGKey(0)
    ks = jax.random.split(key, 8)
    F_DIM = 128                       # ICM feature dim
    clip_param, vcoef, ecoef, eta = 0.2, 0.5, 0.01, 0.01
    dist_entropy = jnp.float32(1.3)

    # TODO(synk): actor_critic.evaluate_actions and icm_model forwards are
    # external modules passed to PPO's __init__; their outputs are synthesized
    # here rather than re-implemented.

    def make_batch(B):
        returns = jax.random.normal(ks[0], (B, 1), jnp.float32)
        value_preds = jax.random.normal(ks[1], (B, 1), jnp.float32)
        values = value_preds + 0.1 * jax.random.normal(ks[2], (B, 1), jnp.float32)
        old_alp = -1.0 + 0.1 * jax.random.normal(ks[3], (B, 1), jnp.float32)
        new_alp = old_alp + 0.05 * jax.random.normal(ks[4], (B, 1), jnp.float32)
        return returns, value_preds, values, new_alp, old_alp

    def check_losses(vloss, aloss, total, args, adv_n=None, B=None):
        ret, vpred, val, alp, oalp = (x.reshape(-1).astype(jnp.float32)
                                      for x in args)
        rv, ra, rt, radv = _ref_losses(ret, vpred, val, alp, oalp, dist_entropy,
                                       clip_param, vcoef, ecoef)
        np.testing.assert_allclose(np.array(vloss), np.array(rv), rtol=1e-5, atol=1e-6)
        np.testing.assert_allclose(np.array(aloss), np.array(ra), rtol=1e-5, atol=1e-6)
        np.testing.assert_allclose(np.array(total), np.array(rt), rtol=1e-5, atol=1e-6)
        if adv_n is not None:
            flat = np.array(adv_n).reshape(-1)
            np.testing.assert_allclose(flat[:B], np.array(radv), rtol=1e-4, atol=1e-5)
            np.testing.assert_allclose(flat[B:], 0.0)   # padded lanes are clean zeros

    # 1) mask-free path (B multiple of 128), f32, packed advantages returned.
    B = 128
    batch = make_batch(B)
    vloss, aloss, total, adv_n = ppo_losses(
        *batch, dist_entropy, clip_param=clip_param, value_loss_coef=vcoef,
        entropy_coef=ecoef, return_advantages=True)
    jax.block_until_ready((vloss, aloss, total, adv_n))
    check_losses(vloss, aloss, total, batch, adv_n, B)

    # 2) masked path (B=200): rollout tensors packed ONCE via pack_rollout,
    #    fresh actor outputs left in (B,1); advantages returned packed.
    B = 200
    batch = make_batch(B)
    ret_p, vpred_p = pack_rollout(batch[0]), pack_rollout(batch[1])
    vloss, aloss, total, adv_n = ppo_losses(
        ret_p, vpred_p, batch[2], batch[3], batch[4], dist_entropy, n=B,
        clip_param=clip_param, value_loss_coef=vcoef, entropy_coef=ecoef,
        return_advantages=True)
    jax.block_until_ready((vloss, aloss, total, adv_n))
    check_losses(vloss, aloss, total, batch, adv_n, B)

    # 3) bf16 operands (half the HBM traffic), losses only (no adv writeback).
    batch_bf16 = tuple(x.astype(jnp.bfloat16) for x in batch)
    vloss, aloss, total = ppo_losses(
        *batch_bf16, dist_entropy, clip_param=clip_param,
        value_loss_coef=vcoef, entropy_coef=ecoef)
    jax.block_until_ready((vloss, aloss, total))
    check_losses(vloss, aloss, total, batch_bf16)

    # Intrinsic reward: exact-tile path (B=8) and boundary-block path (B=20,
    # not a multiple of the tile -> no pad, Pallas masks the boundary writes).
    for B_i in (8, 20):
        real_feat = jax.random.normal(ks[5], (B_i, F_DIM), jnp.float32)
        pred_feat = real_feat + 0.2 * jax.random.normal(ks[6], (B_i, F_DIM), jnp.float32)
        intr = compute_intrinsic_reward(real_feat, pred_feat, eta=eta)
        jax.block_until_ready(intr)
        rintr = eta * jnp.mean((real_feat - pred_feat) ** 2, axis=-1, keepdims=True)
        np.testing.assert_allclose(np.array(intr), np.array(rintr),
                                   rtol=1e-5, atol=1e-7)

    print("KERNEL_OK")
</pallas_src>

<mosaic_0001>
module attributes {stable_mosaic.version = 11 : i64} {
  func.func @_ppo_loss_kernel(%arg0: memref<1xf32, #tpu.memory_space<smem>>, %arg1: memref<1x128xf32, #tpu.memory_space<vmem>>, %arg2: memref<1x128xf32, #tpu.memory_space<vmem>>, %arg3: memref<1x128xf32, #tpu.memory_space<vmem>>, %arg4: memref<1x128xf32, #tpu.memory_space<vmem>>, %arg5: memref<1x128xf32, #tpu.memory_space<vmem>>, %arg6: memref<1x128xf32, #tpu.memory_space<vmem>>, %arg7: memref<1x128xf32, #tpu.memory_space<vmem>>) attributes {dimension_semantics = [], scalar_prefetch = 0 : i64, scratch_operands = 0 : i64, tpu.core_type = #tpu.core_type<tc>} {
    %c0 = arith.constant 0 : index
    %c0_0 = arith.constant 0 : index
    %0 = vector.load %arg1[%c0, %c0_0] : memref<1x128xf32, #tpu.memory_space<vmem>>, vector<1x128xf32>
    %c0_1 = arith.constant 0 : index
    %c0_2 = arith.constant 0 : index
    %1 = vector.load %arg2[%c0_1, %c0_2] : memref<1x128xf32, #tpu.memory_space<vmem>>, vector<1x128xf32>
    %c0_3 = arith.constant 0 : index
    %c0_4 = arith.constant 0 : index
    %2 = vector.load %arg3[%c0_3, %c0_4] : memref<1x128xf32, #tpu.memory_space<vmem>>, vector<1x128xf32>
    %c0_5 = arith.constant 0 : index
    %c0_6 = arith.constant 0 : index
    %3 = vector.load %arg4[%c0_5, %c0_6] : memref<1x128xf32, #tpu.memory_space<vmem>>, vector<1x128xf32>
    %c0_7 = arith.constant 0 : index
    %c0_8 = arith.constant 0 : index
    %4 = vector.load %arg5[%c0_7, %c0_8] : memref<1x128xf32, #tpu.memory_space<vmem>>, vector<1x128xf32>
    %c0_9 = arith.constant 0 : index
    %5 = memref.load %arg0[%c0_9] : memref<1xf32, #tpu.memory_space<smem>>
    %6 = arith.subf %0, %1 : vector<1x128xf32>
    %cst = arith.constant dense<0.000000e+00> : vector<1xf32>
    %7 = vector.multi_reduction <add>, %6, %cst [1] : vector<1x128xf32> to vector<1xf32>
    %8 = vector.shape_cast %7 : vector<1xf32> to vector<1x1xf32>
    %cst_10 = arith.constant dense<0.000000e+00> : vector<1xf32>
    %9 = vector.multi_reduction <add>, %8, %cst_10 [0] : vector<1x1xf32> to vector<1xf32>
    %10 = vector.shape_cast %9 : vector<1xf32> to vector<1x1xf32>
    %cst_11 = arith.constant 7.812500e-03 : f32
    %11 = vector.broadcast %cst_11 : f32 to vector<1x1xf32>
    %12 = arith.mulf %10, %11 : vector<1x1xf32>
    %13 = arith.mulf %6, %6 : vector<1x128xf32>
    %cst_12 = arith.constant dense<0.000000e+00> : vector<1xf32>
    %14 = vector.multi_reduction <add>, %13, %cst_12 [1] : vector<1x128xf32> to vector<1xf32>
    %15 = vector.shape_cast %14 : vector<1xf32> to vector<1x1xf32>
    %cst_13 = arith.constant dense<0.000000e+00> : vector<1xf32>
    %16 = vector.multi_reduction <add>, %15, %cst_13 [0] : vector<1x1xf32> to vector<1xf32>
    %17 = vector.shape_cast %16 : vector<1xf32> to vector<1x1xf32>
    %cst_14 = arith.constant 1.280000e+02 : f32
    %18 = vector.broadcast %cst_14 : f32 to vector<1x1xf32>
    %19 = arith.mulf %18, %12 : vector<1x1xf32>
    %20 = arith.mulf %19, %12 : vector<1x1xf32>
    %21 = arith.subf %17, %20 : vector<1x1xf32>
    %cst_15 = arith.constant 0.00787401571 : f32
    %22 = vector.broadcast %cst_15 : f32 to vector<1x1xf32>
    %23 = arith.mulf %21, %22 : vector<1x1xf32>
    %24 = math.sqrt %23 : vector<1x1xf32>
    %cst_16 = arith.constant 9.99999974E-6 : f32
    %25 = vector.broadcast %cst_16 : f32 to vector<1x1xf32>
    %26 = arith.addf %24, %25 : vector<1x1xf32>
    %27 = tpu.reciprocal %26 : vector<1x1xf32> -> vector<1x1xf32>
    %28 = vector.broadcast %12 : vector<1x1xf32> to vector<1x128xf32>
    %29 = arith.subf %6, %28 : vector<1x128xf32>
    %30 = vector.broadcast %27 : vector<1x1xf32> to vector<1x128xf32>
    %31 = arith.mulf %29, %30 : vector<1x128xf32>
    %32 = arith.subf %3, %4 : vector<1x128xf32>
    %33 = math.exp %32 : vector<1x128xf32>
    %34 = arith.mulf %33, %31 : vector<1x128xf32>
    %cst_17 = arith.constant 8.000000e-01 : f32
    %cst_18 = arith.constant 1.200000e+00 : f32
    %35 = vector.broadcast %cst_17 : f32 to vector<1x128xf32>
    %36 = arith.maximumf %35, %33 : vector<1x128xf32>
    %37 = vector.broadcast %cst_18 : f32 to vector<1x128xf32>
    %38 = arith.minimumf %37, %36 : vector<1x128xf32>
    %39 = arith.mulf %38, %31 : vector<1x128xf32>
    %40 = arith.minimumf %34, %39 : vector<1x128xf32>
    %cst_19 = arith.constant dense<0.000000e+00> : vector<1xf32>
    %41 = vector.multi_reduction <add>, %40, %cst_19 [1] : vector<1x128xf32> to vector<1xf32>
    %42 = vector.shape_cast %41 : vector<1xf32> to vector<1x1xf32>
    %cst_20 = arith.constant dense<0.000000e+00> : vector<1xf32>
    %43 = vector.multi_reduction <add>, %42, %cst_20 [0] : vector<1x1xf32> to vector<1xf32>
    %44 = vector.shape_cast %43 : vector<1xf32> to vector<1x1xf32>
    %cst_21 = arith.constant 0.000000e+00 : f32
    %45 = vector.broadcast %cst_21 : f32 to vector<1x1xf32>
    %46 = arith.subf %45, %44 : vector<1x1xf32>
    %cst_22 = arith.constant 7.812500e-03 : f32
    %47 = vector.broadcast %cst_22 : f32 to vector<1x1xf32>
    %48 = arith.mulf %46, %47 : vector<1x1xf32>
    %49 = arith.subf %2, %1 : vector<1x128xf32>
    %cst_23 = arith.constant -2.000000e-01 : f32
    %cst_24 = arith.constant 2.000000e-01 : f32
    %50 = vector.broadcast %cst_23 : f32 to vector<1x128xf32>
    %51 = arith.maximumf %50, %49 : vector<1x128xf32>
    %52 = vector.broadcast %cst_24 : f32 to vector<1x128xf32>
    %53 = arith.minimumf %52, %51 : vector<1x128xf32>
    %54 = arith.addf %1, %53 : vector<1x128xf32>
    %55 = arith.subf %2, %0 : vector<1x128xf32>
    %56 = arith.mulf %55, %55 : vector<1x128xf32>
    %57 = arith.subf %54, %0 : vector<1x128xf32>
    %58 = arith.mulf %57, %57 : vector<1x128xf32>
    %59 = arith.maximumf %56, %58 : vector<1x128xf32>
    %cst_25 = arith.constant dense<0.000000e+00> : vector<1xf32>
    %60 = vector.multi_reduction <add>, %59, %cst_25 [1] : vector<1x128xf32> to vector<1xf32>
    %61 = vector.shape_cast %60 : vector<1xf32> to vector<1x1xf32>
    %cst_26 = arith.constant dense<0.000000e+00> : vector<1xf32>
    %62 = vector.multi_reduction <add>, %61, %cst_26 [0] : vector<1x1xf32> to vector<1xf32>
    %63 = vector.shape_cast %62 : vector<1xf32> to vector<1x1xf32>
    %cst_27 = arith.constant 5.000000e-01 : f32
    %64 = vector.broadcast %cst_27 : f32 to vector<1x1xf32>
    %65 = arith.mulf %64, %63 : vector<1x1xf32>
    %cst_28 = arith.constant 7.812500e-03 : f32
    %66 = vector.broadcast %cst_28 : f32 to vector<1x1xf32>
    %67 = arith.mulf %65, %66 : vector<1x1xf32>
    %cst_29 = arith.constant 5.000000e-01 : f32
    %68 = vector.broadcast %cst_29 : f32 to vector<1x1xf32>
    %69 = arith.mulf %67, %68 : vector<1x1xf32>
    %70 = arith.addf %69, %48 : vector<1x1xf32>
    %cst_30 = arith.constant 0.00999999977 : f32
    %71 = arith.mulf %5, %cst_30 : f32
    %72 = vector.broadcast %71 : f32 to vector<1x1xf32>
    %73 = arith.subf %70, %72 : vector<1x1xf32>
    %74 = tpu.iota {dimensions = array<i32: 1>} : vector<1x128xi32>
    %c0_i32 = arith.constant 0 : i32
    %75 = vector.broadcast %c0_i32 : i32 to vector<1x128xi32>
    %76 = arith.cmpi eq, %74, %75 : vector<1x128xi32>
    %cst_31 = arith.constant 0.000000e+00 : f32
    %77 = vector.shape_cast %67 : vector<1x1xf32> to vector<1x1xf32>
    %78 = vector.broadcast %77 : vector<1x1xf32> to vector<1x128xf32>
    %79 = vector.broadcast %cst_31 : f32 to vector<1x128xf32>
    %80 = arith.select %76, %78, %79 : vector<1x128xi1>, vector<1x128xf32>
    %c1_i32 = arith.constant 1 : i32
    %81 = vector.broadcast %c1_i32 : i32 to vector<1x128xi32>
    %82 = arith.cmpi eq, %74, %81 : vector<1x128xi32>
    %cst_32 = arith.constant 0.000000e+00 : f32
    %83 = vector.shape_cast %48 : vector<1x1xf32> to vector<1x1xf32>
    %84 = vector.broadcast %83 : vector<1x1xf32> to vector<1x128xf32>
    %85 = vector.broadcast %cst_32 : f32 to vector<1x128xf32>
    %86 = arith.select %82, %84, %85 : vector<1x128xi1>, vector<1x128xf32>
    %87 = arith.addf %80, %86 : vector<1x128xf32>
    %c2_i32 = arith.constant 2 : i32
    %88 = vector.broadcast %c2_i32 : i32 to vector<1x128xi32>
    %89 = arith.cmpi eq, %74, %88 : vector<1x128xi32>
    %cst_33 = arith.constant 0.000000e+00 : f32
    %90 = vector.shape_cast %73 : vector<1x1xf32> to vector<1x1xf32>
    %91 = vector.broadcast %90 : vector<1x1xf32> to vector<1x128xf32>
    %92 = vector.broadcast %cst_33 : f32 to vector<1x128xf32>
    %93 = arith.select %89, %91, %92 : vector<1x128xi1>, vector<1x128xf32>
    %94 = arith.addf %87, %93 : vector<1x128xf32>
    %c0_34 = arith.constant 0 : index
    %c0_35 = arith.constant 0 : index
    %95 = vector.load %arg6[%c0_34, %c0_35] : memref<1x128xf32, #tpu.memory_space<vmem>>, vector<1x128xf32>
    tpu.vector_store %arg6[%c0_34, %c0_35], %94 {strides = array<i32>} : memref<1x128xf32, #tpu.memory_space<vmem>>, vector<1x128xf32>,
    %c0_36 = arith.constant 0 : index
    %c0_37 = arith.constant 0 : index
    %96 = vector.load %arg7[%c0_36, %c0_37] : memref<1x128xf32, #tpu.memory_space<vmem>>, vector<1x128xf32>
    tpu.vector_store %arg7[%c0_36, %c0_37], %31 {strides = array<i32>} : memref<1x128xf32, #tpu.memory_space<vmem>>, vector<1x128xf32>,
    return
  }
}

</mosaic_0001>

<bundles_post_ra>
// kernel: tpu_custom_call.1
= control target key start
LH: loop header
LB: loop body
LE: loop exit
PB: predicated region body
PF: predicated region fallthrough
CT: control target
= control target key end

     0   :  { %14 = vsyncpa [#allocation4], 0  ;;  %vm35_vm0 = vcmask 1040384   ;;  %s280_s0 = inlined_call_operand.<no memory space> [shape: f32[1], index: 0, kind: input, shape index: {}]   ;;  %s281_s1 = inlined_call_operand.vmem [shape: f32[1,128], index: 1, kind: input, shape index: {}]   ;;  %s282_s2 = inlined_call_operand.vmem [shape: f32[1,128], index: 2, kind: input, shape index: {}]   ;;  %s283_s3 = inlined_call_operand.vmem [shape: f32[1,128], index: 3, kind: input, shape index: {}]   ;;  %s284_s4 = inlined_call_operand.vmem [shape: f32[1,128], index: 4, kind: input, shape index: {}]   ;;  %s285_s5 = inlined_call_operand.vmem [shape: f32[1,128], index: 5, kind: input, shape index: {}]   ;;  %s286_s6 = inlined_call_operand.hbm [shape: f32[1,128], index: 6, kind: output, shape index: {0}]   ;;  %s287_s7 = inlined_call_operand.hbm [shape: f32[1,128], index: 7, kind: output, shape index: {1}]  }
   0x1   :  { %v28_v0 = vld [vmem:[%s281_s1] sm:$0x1] }
   0x2   :  { %v29_v1 = vld [vmem:[%s282_s2] sm:$0x1] }
   0x3   :  { %v34_v2 = vsub.f32 %v28_v0, %v29_v1 }
   0x4   :  { %15 = vsyncpa [#allocation6], 0  ;;  %v30_v6 = vld [vmem:[%s283_s3] sm:$0x1] }
   0x5   :  { %v36_v3 = vsel %vm35_vm0, %v34_v2, 0.0  ;;  %v41_v4 = vmul.f32 %v34_v2, %v34_v2  ;;  %v75_v7 = vsub.f32 %v30_v6, %v29_v1  ;;  %v79_v9 = vsub.f32 %v30_v6, %v28_v0  ;;  %v31_v23 = vld [vmem:[%s284_s4] sm:$0x1]  ;;  %s192_s4 = smov [#allocation5]  }
   0x6   :  { %37 = vadd.xlane.f32.xlu0 %v36_v3  ;;  %v32_v24 = vld [vmem:[%s285_s5] sm:$0x1]  ;;  %s123_s5 = sshll.u32 %s192_s4, 4  ;;  %s124_s5 = int_to_ptr.vmem [resolvable:$true] %s123_s5 }
   0x7   :  { %v42_v5 = vsel %vm35_vm0, %v41_v4, 0.0  ;;  %v135_v8 = vclamps-f32 %v75_v7, 0.2  ;;  %v80_v11 = vmul.f32 %v79_v9, %v79_v9  ;;  %v61_v25 = vsub.f32 %v31_v23, %v32_v24  ;;  %s144_s8 = scalar_lea.vmem %s124_s5, 16  ;;  %s148_s9 = scalar_lea.vmem %s124_s5, 32 }
   0x8   :  { %p145_p0 = scmp.ne.s32.totalorder %s124_s5, %s144_s8  ;;  %p149_p1 = scmp.lt.s32.totalorder %s124_s5, %s124_s5 }
   0x9   :  { %v78_v10 = vadd.f32 %v135_v8, %v29_v1  ;;  %v62_v26 = vmul.f32 1.442695, %v61_v25  ;;  %p150_p2 = scmp.lt.s32.totalorder %s148_s9, %s144_s8 }
   0xa   :  { %43 = vadd.xlane.f32.xlu0 %v42_v5 }
   0xb   :  { %v81_v12 = vsub.f32 %v78_v10, %v28_v0  ;;  %p151_p3 = por %p150_p2, %p149_p1 }
   0xd   :  { %v82_v13 = vmul.f32 %v81_v12, %v81_v12  ;;  %p152_p4 = pnand %p151_p3, %p145_p0 }
   0xf   :  { %v83_v14 = vmax.f32 %v80_v11, %v82_v13 }
  0x11   :  { %v84_v15 = vsel %vm35_vm0, %v83_v14, 0.0 }
  0x12   :  { %85 = vadd.xlane.f32.xlu1 %v84_v15 }
  0x93   :  { %v38_v16 = vpop.xlane.xlu0 %37 }
  0x94   :  { %v40_v17 = vmul.f32 0.0078125, %v38_v16 }
  0x96   :  { %v46_v18 = vmul.f32 128.0, %v40_v17  ;;  %v59_v35 = vsub.f32 %v34_v2, %v40_v17 }
  0x97   :  { %v44_v19 = vpop.xlane.xlu0 %43 }
  0x98   :  { %v47_v20 = vmul.f32 %v46_v18, %v40_v17 }
  0x9a   :  { %v48_v21 = vsub.f32 %v44_v19, %v47_v20 }
  0x9c   :  { %v49_v22 = vmul.f32 0.007874016, %v48_v21 }
  0x9e   :  { %138 = vrsqrt.f32 %v49_v22  ;;  %vm52_vm1 = vcmp.eq.f32.partialorder %v49_v22, inf  ;;  %v55_v29 = vand.u32 2147483648, %v49_v22  ;;  %vm54_vm2 = vcmp.eq.f32.partialorder %v49_v22, 0.0 }
  0x9f   :  { %140 = vpow2.f32 %v62_v26 }
  0xa8   :  { %v139_v27 = vpop.eup %138 }
  0xa9   :  { %v51_v28 = vmul.f32 %v139_v27, %v49_v22  ;;  %v141_v33 = vpop.eup %140 }
  0xaa   :  { %v65_v34 = vmax.f32 %v141_v33, 0.8 }
  0xab   :  { %v53_v30 = vsel %vm52_vm1, %v49_v22, %v51_v28 }
  0xac   :  { %v56_v31 = vsel %vm54_vm2, %v55_v29, %v53_v30  ;;  %v66_v36 = vmin.f32 %v65_v34, 1.2 }
  0xad   :  { %v57_v32 = vadd.f32 1e-05, %v56_v31 }
  0xaf   :  { %142 = vrcp.f32 %v57_v32 }
  0xb9   :  { %v143_v37 = vpop.eup %142 }
  0xba   :  { %v60_v38 = vmul.f32 %v143_v37, %v59_v35 }
  0xbc   :  { %v64_v39 = vmul.f32 %v141_v33, %v60_v38  ;;  %v67_v40 = vmul.f32 %v66_v36, %v60_v38  ;;  %106 = vst [vmem:[#allocation5] sm:$0x1] %v60_v38 }
  0xbe   :  { %v68_v41 = vmin.f32 %v64_v39, %v67_v40 }
  0xc0   :  { %v69_v42 = vsel %vm35_vm0, %v68_v41, 0.0 }
  0xc1   :  { %70 = vadd.xlane.f32.xlu1 %v69_v42 }
  0xc2   :  { %155 = shalt.err (!%p152_p4)
}
  0xc3   :  { %s156_s12 = scalar_lea.hbm %s287_s7, 16 }
  0xc4   :  { %p157_p5 = scmp.ne.s32.totalorder %s287_s7, %s156_s12  ;;  %p160_p6 = scmp.lt.u32.totalorder %s156_s12, %s287_s7 }
  0xc6   :  { %p162_p7 = pnand %p160_p6, %p157_p5 }
  0xc8   :  { %165 = shalt.err (!%p162_p7)
}
  0xc9   :  { %126 = dma.vmem_to_hbm [thread:$0]  %s124_s5, 16, %s287_s7, [#allocation6]   ;;  %v86_v43 = vpop.xlane.xlu1 %85  ;;  %v95_v45 = vlaneseq }
  0xca   :  { %v88_v44 = vmul.f32 0.5, %v86_v43  ;;  %s92_s21 = smul.f32 0.01, %s280_s0  ;;  %s193_s7 = smov [#allocation3]  }
  0xcb   :  { %v96_v47 = vand.u32 127, %v95_v45  ;;  %s113_s22 = sshll.u32 %s193_s7, 4  ;;  %s114_s22 = int_to_ptr.vmem [resolvable:$true] %s113_s22 }
  0xcc   :  { %v89_v46 = vmul.f32 0.0078125, %v88_v44  ;;  %v93_v52 = vstv %s92_s21  ;;  %s166_s23 = scalar_lea.vmem %s114_s22, 16  ;;  %s170_s0 = scalar_lea.vmem %s114_s22, 32 }
  0xcd   :  { %vm99_vm3 = vcmp.eq.s32.totalorder %v96_v47, 1  ;;  %vm97_vm4 = vcmp.eq.s32.totalorder %v96_v47, 0  ;;  %vm102_vm5 = vcmp.eq.s32.totalorder %v96_v47, 2  ;;  %p167_p8 = scmp.ne.s32.totalorder %s114_s22, %s166_s23  ;;  %p171_p9 = scmp.lt.s32.totalorder %s114_s22, %s114_s22 }
  0xce   :  { %v90_v50 = vmul.f32 0.5, %v89_v46  ;;  %v98_v55 = vsel %vm97_vm4, %v89_v46, 0.0  ;;  %p172_p10 = scmp.lt.s32.totalorder %s170_s0, %s166_s23 }
  0xd0   :  { %p173_p11 = por %p172_p10, %p171_p9 }
  0xd2   :  { %p174_p12 = pnand %p173_p11, %p167_p8 }
 0x14e   :  { %v71_v48 = vpop.xlane.xlu1 %70 }
 0x14f   :  { %v73_v49 = vsub.f32 0.0, %v71_v48 }
 0x151   :  { %v74_v51 = vmul.f32 0.0078125, %v73_v49 }
 0x153   :  { %v91_v53 = vadd.f32 %v90_v50, %v74_v51  ;;  %v100_v54 = vsel %vm99_vm3, %v74_v51, 0.0 }
 0x154   :  { %v101_v57 = vadd.f32 %v100_v54, %v98_v55 }
 0x155   :  { %v94_v56 = vsub.f32 %v91_v53, %v93_v52 }
 0x157   :  { %v103_v58 = vsel %vm102_vm5, %v94_v56, 0.0 }
 0x158   :  { %v104_v59 = vadd.f32 %v103_v58, %v101_v57 }
 0x15a   :  { %105 = vst [vmem:[#allocation3] sm:$0x1] %v104_v59 }
 0x15b   :  { %177 = shalt.err (!%p174_p12)
}
 0x15c   :  { %s178_s26 = scalar_lea.hbm %s286_s6, 16 }
 0x15d   :  { %p179_p13 = scmp.ne.s32.totalorder %s286_s6, %s178_s26  ;;  %p182_p0 = scmp.lt.u32.totalorder %s178_s26, %s286_s6 }
 0x15f   :  { %p184_p1 = pnand %p182_p0, %p179_p13 }
 0x161   :  { %187 = shalt.err (!%p184_p1)
}
 0x162   :  { %116 = dma.vmem_to_hbm [thread:$0]  %s114_s22, 16, %s286_s6, [#allocation4]  }
 0x163   :  { %188 = dma.done.wait [#allocation4], 16  }
 0x164   :  { %189 = vsyncadd [#allocation4], 4294967280 }
 0x165   :  { %190 = dma.done.wait [#allocation6], 16  }
 0x166   :  { %191 = vsyncadd [#allocation6], 4294967280 }
 0x167   :  { %133 = vsyncpa [#allocation4], 1 }
 0x168   :  { %134 = vsyncpa [#allocation6], 1 }

</bundles_post_ra>
